<compile_context>
chip_gen: v7x
topology: tpu7x:2x2x1
jax: 0.10.0
libtpu: 0.0.40
codegen_flags: <defaults>
</compile_context>

<pallas_src>
import numpy as np
import jax
import jax.numpy as jnp
from jax import lax
from jax.experimental import pallas as pl
from jax.experimental.pallas import tpu as pltpu

EPS = 1e-5


# --------------------------------------------------------------------------
# glue: parameter setup helpers (plain numpy, not part of the hot path)
# --------------------------------------------------------------------------
def _round_up(a, b):
    return (a + b - 1) // b * b


def _fuse_bn(gamma, beta, mean, var, eps=EPS):
    gamma, beta, mean, var = (np.asarray(a, np.float32) for a in (gamma, beta, mean, var))
    scale = gamma / np.sqrt(var + eps)
    shift = beta - mean * scale
    return scale.astype(np.float32), shift.astype(np.float32)


def _toeplitz_conv_weight(w, T, stride, padding):
    """Expand Conv1d weight (Co, Ci, K) to a (Ci*T, Co*Tout) matmul operand.

    Row index = ci*T + t (un-padded input time), col index = co*Tout + to.
    Zero padding of the conv is folded in by omitting out-of-range taps.
    """
    Co, Ci, K = w.shape
    Tout = (T + 2 * padding - K) // stride + 1
    Wbig = np.zeros((Ci * T, Co * Tout), dtype=np.float32)
    for co in range(Co):
        for ci in range(Ci):
            for to in range(Tout):
                for k in range(K):
                    t = stride * to - padding + k
                    if 0 <= t < T:
                        Wbig[ci * T + t, co * Tout + to] = w[co, ci, k]
    return Wbig, Tout


# --------------------------------------------------------------------------
# Pallas kernel: relu(bn1(x)) -> single fused MXU matmul (main conv + residual
# conv, bn2 and both biases pre-folded into weight / shift) -> store.
# --------------------------------------------------------------------------
def tcn_kernel(x_ref, w_ref, s1_ref, b1_ref, shift_ref, o_ref):
    # x tile: (Ci*T, TB)  lane-dense over the B axis, bf16 in HBM.
    x = x_ref[...].astype(jnp.float32)

    # relu(bn1(x)) -- bn1 fused to per-(channel,time) scale/shift, f32 VPU math.
    act = jnp.maximum(x * s1_ref[...] + b1_ref[...], 0.0)

    # Single MXU call: lhs = [relu(bn1(x)); x] along K, weight = [Wc*s2; Wr*s2].
    lhs = jnp.concatenate([act, x], axis=0).astype(jnp.bfloat16)     # (2*Ci*T, TB)
    y = jnp.dot(w_ref[...], lhs, preferred_element_type=jnp.float32)  # (Co*Tout, TB)

    # One additive shift = s2*(b_conv + b_res) + 2*bn2_shift (folded).
    o_ref[...] = (y + shift_ref[...]).astype(o_ref.dtype)


# --------------------------------------------------------------------------
# wrapper
# --------------------------------------------------------------------------
def tcn_block_forward(x, params, *, kernel_size, stride, padding, block_tb=512):
    N, T, C, H, W = x.shape
    Ci = C
    w_conv = np.asarray(params["w_conv"], np.float32)            # (Co, Ci, K)
    b_conv = np.asarray(params["b_conv"], np.float32)            # (Co,)
    Co, _, K = w_conv.shape
    assert K == kernel_size

    # ---- parameter expansion + bn2/bias folding (glue, host side) ----
    Wc, Tout = _toeplitz_conv_weight(w_conv, T, stride, padding)
    if params["w_res"] is None:                                   # identity residual
        assert Ci == Co and stride == 1
        w_res = np.eye(Co, Ci, dtype=np.float32)
        b_res = np.zeros((Co,), np.float32)
    else:
        w_res = np.asarray(params["w_res"], np.float32)           # (Co, Ci)
        b_res = np.asarray(params["b_res"], np.float32)
    Wr, Tout_r = _toeplitz_conv_weight(w_res[:, :, None], T, stride, 0)
    assert Tout_r == Tout, "main / residual output lengths must match"

    s1, sh1 = _fuse_bn(params["g1"], params["be1"], params["m1"], params["v1"])
    s2, sh2 = _fuse_bn(params["g2"], params["be2"], params["m2"], params["v2"])

    s2r = np.repeat(s2, Tout)                                     # (Co*Tout,)
    sh2r = np.repeat(sh2, Tout)
    bcr = np.repeat(b_conv, Tout)
    brr = np.repeat(b_res, Tout)

    # bn2 folded into weight columns; both branch biases + 2*bn2-shift folded
    # into one additive vector.  Stack main + residual -> single MXU operand.
    W_stack = np.concatenate([Wc * s2r[None, :], Wr * s2r[None, :]], axis=0)  # (2CiT, CoT)
    Wt = np.ascontiguousarray(W_stack.T)                          # (CoT, 2CiT)
    shift = (s2r * (bcr + brr) + 2.0 * sh2r).astype(np.float32)   # (CoT,)

    s1_col = np.repeat(s1, T)[:, None].astype(np.float32)         # (Ci*T, 1)
    b1_col = np.repeat(sh1, T)[:, None].astype(np.float32)
    shift_col = shift[:, None]                                    # (CoT, 1)

    CiT, CoT = Ci * T, Co * Tout
    K2 = 2 * CiT

    # ---- data layout (glue): (N,T,C,H,W) -> (Ci*T, B), B on lanes ----
    B = N * H * W
    xT = jnp.transpose(x, (2, 1, 0, 3, 4)).reshape(CiT, B).astype(jnp.bfloat16)

    # Lane-dense B tiling: blocks are multiples of 128; cdiv + zero-pad tail
    # (no divisor assert).  NOTE(v7x): with large inputs keep >= 2 grid steps
    # so both TensorCores get work.
    block_tb = min(int(block_tb), _round_up(B, 128))
    block_tb = _round_up(block_tb, 128)
    B_pad = _round_up(B, block_tb)
    if B_pad != B:
        xT = jnp.pad(xT, ((0, 0), (0, B_pad - B)))
    grid = (B_pad // block_tb,)

    # ---- explicit VMEM budget (double-buffered pipeline) with headroom ----
    need = 2 * (CiT * block_tb * 2            # x tile (bf16)
                + CoT * block_tb * 4          # out tile (f32)
                + CoT * K2 * 2                # fused weight (bf16)
                + (2 * CiT + CoT) * 4)        # bn1 scale/shift + shift columns
    vmem_limit = int(min(max(2 * need + (2 << 20), 8 << 20), 64 << 20))

    outT = pl.pallas_call(
        tcn_kernel,
        out_shape=jax.ShapeDtypeStruct((CoT, B_pad), jnp.float32),
        grid_spec=pltpu.PrefetchScalarGridSpec(
            num_scalar_prefetch=0,
            grid=grid,
            in_specs=[
                pl.BlockSpec((CiT, block_tb), lambda i: (0, i)),   # x (bf16)
                pl.BlockSpec((CoT, K2), lambda i: (0, 0)),         # fused weight (bf16)
                pl.BlockSpec((CiT, 1), lambda i: (0, 0)),          # bn1 scale
                pl.BlockSpec((CiT, 1), lambda i: (0, 0)),          # bn1 shift
                pl.BlockSpec((CoT, 1), lambda i: (0, 0)),          # fused output shift
            ],
            out_specs=pl.BlockSpec((CoT, block_tb), lambda i: (0, i)),
        ),
        compiler_params=pltpu.CompilerParams(
            dimension_semantics=("parallel",),
            vmem_limit_bytes=vmem_limit),
    )(xT,
      jnp.asarray(Wt, dtype=jnp.bfloat16),
      jnp.asarray(s1_col), jnp.asarray(b1_col), jnp.asarray(shift_col))

    # ---- back to PyTorch output layout: (N, Tout, Co, H, W) ----
    outT = outT[:, :B]
    out = outT.reshape(Co, Tout, N, H, W)
    return jnp.transpose(out, (2, 1, 0, 3, 4))


# --------------------------------------------------------------------------
# pure-JAX f32 reference (eval-mode BN) used only to verify the kernel
# --------------------------------------------------------------------------
def ref_forward(x, params, *, kernel_size, stride, padding):
    N, T, C, H, W = x.shape
    xb = jnp.transpose(x, (0, 3, 4, 2, 1)).reshape(N * H * W, C, T).astype(jnp.float32)

    def bn(v, g, b, m, var):
        g, b, m, var = (jnp.asarray(a, jnp.float32) for a in (g, b, m, var))
        return (v - m[None, :, None]) / jnp.sqrt(var[None, :, None] + EPS) \
               * g[None, :, None] + b[None, :, None]

    if params["w_res"] is None:
        res = xb
    else:
        wr3 = jnp.asarray(params["w_res"], jnp.float32)[:, :, None]
        res = lax.conv_general_dilated(xb, wr3, (stride,), [(0, 0)],
                                       dimension_numbers=("NCH", "OIH", "NCH"))
        res = res + jnp.asarray(params["b_res"], jnp.float32)[None, :, None]
    res = bn(res, params["g2"], params["be2"], params["m2"], params["v2"])

    a = jax.nn.relu(bn(xb, params["g1"], params["be1"], params["m1"], params["v1"]))
    y = lax.conv_general_dilated(a, jnp.asarray(params["w_conv"], jnp.float32),
                                 (stride,), [(padding, padding)],
                                 dimension_numbers=("NCH", "OIH", "NCH"))
    y = y + jnp.asarray(params["b_conv"], jnp.float32)[None, :, None]
    y = bn(y, params["g2"], params["be2"], params["m2"], params["v2"])

    out = y + res
    Co, Tout = out.shape[1], out.shape[2]
    out = out.reshape(N, H, W, Co, Tout)
    return jnp.transpose(out, (0, 4, 3, 1, 2))


# --------------------------------------------------------------------------
def _make_params(key, in_ch, out_ch, K, stride):
    kw, kb, kwr, kbr = jax.random.split(key, 4)
    params = dict(
        w_conv=np.asarray(jax.random.normal(kw, (out_ch, in_ch, K)) * 0.1, np.float32),
        b_conv=np.asarray(jax.random.normal(kb, (out_ch,)) * 0.1, np.float32),
        g1=1.0 + 0.10 * np.arange(in_ch, dtype=np.float32),
        be1=0.05 * np.arange(in_ch, dtype=np.float32),
        m1=0.01 * np.arange(in_ch, dtype=np.float32),
        v1=1.0 + 0.02 * np.arange(in_ch, dtype=np.float32),
        g2=1.0 - 0.03 * np.arange(out_ch, dtype=np.float32),
        be2=-0.02 * np.arange(out_ch, dtype=np.float32),
        m2=0.015 * np.arange(out_ch, dtype=np.float32),
        v2=1.0 + 0.05 * np.arange(out_ch, dtype=np.float32),
    )
    if in_ch == out_ch and stride == 1:
        # PyTorch TCNBlock: identity residual, but bn2 IS still applied to it.
        params["w_res"] = None
        params["b_res"] = None
    else:
        params["w_res"] = np.asarray(jax.random.normal(kwr, (out_ch, in_ch)) * 0.1, np.float32)
        params["b_res"] = np.asarray(jax.random.normal(kbr, (out_ch,)) * 0.1, np.float32)
    return params


if __name__ == "__main__":
    key = jax.random.PRNGKey(0)
    N, T, C, H, W = 2, 8, 4, 4, 4

    # bf16 MXU operands -> compare against a pure-f32 reference with a
    # bf16-appropriate tolerance.
    ATOL, RTOL = 3e-2, 2e-2

    configs = [
        # (in_ch, out_ch, K, stride, padding)  -> 1x1-conv residual branch
        (C, 8, 3, 1, 1),
        # identity residual branch (in_ch == out_ch, stride == 1)
        (C, C, 3, 1, 1),
    ]

    for cfg_i, (in_ch, out_ch, K, stride, padding) in enumerate(configs):
        kx, kp, key = jax.random.split(key, 3)
        x = jax.random.normal(kx, (N, T, C, H, W), dtype=jnp.float32)
        params = _make_params(kp, in_ch, out_ch, K, stride)

        out = tcn_block_forward(x, params, kernel_size=K, stride=stride,
                                padding=padding, block_tb=512)
        out = jax.block_until_ready(out)

        ref = ref_forward(x, params, kernel_size=K, stride=stride, padding=padding)
        Tout = (T + 2 * padding - K) // stride + 1
        assert out.shape == ref.shape == (N, Tout, out_ch, H, W)
        np.testing.assert_allclose(np.asarray(out), np.asarray(ref),
                                   atol=ATOL, rtol=RTOL)

    print("KERNEL_OK")
</pallas_src>

<mosaic_0001>
module attributes {stable_mosaic.version = 11 : i64} {
  func.func @tcn_kernel(%arg0: i32, %arg1: memref<32x128xbf16, #tpu.memory_space<vmem>>, %arg2: memref<64x64xbf16, #tpu.memory_space<vmem>>, %arg3: memref<32x1xf32, #tpu.memory_space<vmem>>, %arg4: memref<32x1xf32, #tpu.memory_space<vmem>>, %arg5: memref<64x1xf32, #tpu.memory_space<vmem>>, %arg6: memref<64x128xf32, #tpu.memory_space<vmem>>) attributes {dimension_semantics = [#tpu.dimension_semantics<parallel>], iteration_bounds = array<i64: 1>, scalar_prefetch = 0 : i64, scratch_operands = 0 : i64, tpu.core_type = #tpu.core_type<tc>, window_params = [{transform_indices = @transform_0, window_bounds = array<i64: 32, 128>}, {pipeline_mode = #tpu.pipeline_mode<synchronous>, transform_indices = @transform_1, window_bounds = array<i64: 64, 64>}, {pipeline_mode = #tpu.pipeline_mode<synchronous>, transform_indices = @transform_2, window_bounds = array<i64: 32, 1>}, {pipeline_mode = #tpu.pipeline_mode<synchronous>, transform_indices = @transform_3, window_bounds = array<i64: 32, 1>}, {pipeline_mode = #tpu.pipeline_mode<synchronous>, transform_indices = @transform_4, window_bounds = array<i64: 64, 1>}, {transform_indices = @transform_5, window_bounds = array<i64: 64, 128>}]} {
    %c0 = arith.constant 0 : index
    %c0_0 = arith.constant 0 : index
    %0 = vector.load %arg1[%c0, %c0_0] : memref<32x128xbf16, #tpu.memory_space<vmem>>, vector<32x128xbf16>
    %1 = arith.extf %0 : vector<32x128xbf16> to vector<32x128xf32>
    %c0_1 = arith.constant 0 : index
    %c0_2 = arith.constant 0 : index
    %2 = vector.load %arg3[%c0_1, %c0_2] : memref<32x1xf32, #tpu.memory_space<vmem>>, vector<32x1xf32>
    %3 = vector.broadcast %2 : vector<32x1xf32> to vector<32x128xf32>
    %4 = arith.mulf %1, %3 : vector<32x128xf32>
    %c0_3 = arith.constant 0 : index
    %c0_4 = arith.constant 0 : index
    %5 = vector.load %arg4[%c0_3, %c0_4] : memref<32x1xf32, #tpu.memory_space<vmem>>, vector<32x1xf32>
    %6 = vector.broadcast %5 : vector<32x1xf32> to vector<32x128xf32>
    %7 = arith.addf %4, %6 : vector<32x128xf32>
    %cst = arith.constant 0.000000e+00 : f32
    %8 = vector.broadcast %cst : f32 to vector<32x128xf32>
    %9 = arith.maximumf %7, %8 : vector<32x128xf32>
    %10 = tpu.concatenate %9, %1 in 0 : vector<32x128xf32>, vector<32x128xf32> -> vector<64x128xf32>
    %11 = arith.truncf %10 : vector<64x128xf32> to vector<64x128xbf16>
    %c0_5 = arith.constant 0 : index
    %c0_6 = arith.constant 0 : index
    %12 = vector.load %arg2[%c0_5, %c0_6] : memref<64x64xbf16, #tpu.memory_space<vmem>>, vector<64x64xbf16>
    %cst_7 = arith.constant dense<0.000000e+00> : vector<64x128xf32>
    %13 = tpu.matmul %12, %11, %cst_7 {dimension_numbers = #tpu.dot_dimension_numbers<[1], [0], [0], [1], [0, 0, 1, 1], [], []>} : vector<64x64xbf16>, vector<64x128xbf16>, vector<64x128xf32> -> vector<64x128xf32>
    %c0_8 = arith.constant 0 : index
    %c0_9 = arith.constant 0 : index
    %14 = vector.load %arg5[%c0_8, %c0_9] : memref<64x1xf32, #tpu.memory_space<vmem>>, vector<64x1xf32>
    %15 = vector.broadcast %14 : vector<64x1xf32> to vector<64x128xf32>
    %16 = arith.addf %13, %15 : vector<64x128xf32>
    %c0_10 = arith.constant 0 : index
    %c0_11 = arith.constant 0 : index
    %17 = vector.load %arg6[%c0_10, %c0_11] : memref<64x128xf32, #tpu.memory_space<vmem>>, vector<64x128xf32>
    tpu.vector_store %arg6[%c0_10, %c0_11], %16 {strides = array<i32>} : memref<64x128xf32, #tpu.memory_space<vmem>>, vector<64x128xf32>,
    return
  }
  func.func @transform_0(%arg0: i32) -> (i32, i32) {
    %c0_i32 = arith.constant 0 : i32
    %c0_i32_0 = arith.constant 0 : i32
    return %c0_i32, %arg0 : i32, i32
  }
  func.func @transform_1(%arg0: i32) -> (i32, i32) {
    %c0_i32 = arith.constant 0 : i32
    %c0_i32_0 = arith.constant 0 : i32
    %c0_i32_1 = arith.constant 0 : i32
    return %c0_i32, %c0_i32_0 : i32, i32
  }
  func.func @transform_2(%arg0: i32) -> (i32, i32) {
    %c0_i32 = arith.constant 0 : i32
    %c0_i32_0 = arith.constant 0 : i32
    %c0_i32_1 = arith.constant 0 : i32
    return %c0_i32, %c0_i32_0 : i32, i32
  }
  func.func @transform_3(%arg0: i32) -> (i32, i32) {
    %c0_i32 = arith.constant 0 : i32
    %c0_i32_0 = arith.constant 0 : i32
    %c0_i32_1 = arith.constant 0 : i32
    return %c0_i32, %c0_i32_0 : i32, i32
  }
  func.func @transform_4(%arg0: i32) -> (i32, i32) {
    %c0_i32 = arith.constant 0 : i32
    %c0_i32_0 = arith.constant 0 : i32
    %c0_i32_1 = arith.constant 0 : i32
    return %c0_i32, %c0_i32_0 : i32, i32
  }
  func.func @transform_5(%arg0: i32) -> (i32, i32) {
    %c0_i32 = arith.constant 0 : i32
    %c0_i32_0 = arith.constant 0 : i32
    return %c0_i32, %arg0 : i32, i32
  }
}

</mosaic_0001>

<bundles_post_ra>
// kernel: tpu_custom_call.1
= control target key start
LH: loop header
LB: loop body
LE: loop exit
PB: predicated region body
PF: predicated region fallthrough
CT: control target
= control target key end

     0   :  { %v352_v2 = vmov 0   ;;  %s468_s0 = inlined_call_operand.vmem [shape: bf16[32,128], index: 0, kind: input, shape index: {}]   ;;  %s469_s1 = inlined_call_operand.vmem [shape: bf16[64,64], index: 1, kind: input, shape index: {}]   ;;  %s470_s2 = inlined_call_operand.vmem [shape: f32[32,1], index: 2, kind: input, shape index: {}]   ;;  %s471_s3 = inlined_call_operand.vmem [shape: f32[32,1], index: 3, kind: input, shape index: {}]   ;;  %s472_s4 = inlined_call_operand.vmem [shape: f32[64,1], index: 4, kind: input, shape index: {}]   ;;  %s473_s5 = inlined_call_operand.hbm [shape: f32[64,128], index: 5, kind: output, shape index: {}]  }
   0x1   :  { %v58_v0 = vld [vmem:[%s471_s3] sm:$0xff]  ;;  %319 = vset.pattern.permute.xlu1 %v352_v2  ;;  %318 = vset.pattern.permute.xlu0 %v352_v2  ;;  %v59_v3 = vld [vmem:[%s471_s3 + $0x8] sm:$0xff]  ;;  %v33_v5 = vld [vmem:[%s470_s2 + $0x18] sm:$0xff] }
   0x2   :  { %v30_v1 = vld [vmem:[%s470_s2] sm:$0xff]  ;;  %64 = vperm.xlu1 %319, %v58_v0   ;;  %v31_v4 = vld [vmem:[%s470_s2 + $0x8] sm:$0xff]  ;;  %v32_v6 = vld [vmem:[%s470_s2 + $0x10] sm:$0xff] }
   0x3   :  { %36 = vperm.xlu0 %318, %v30_v1  }
   0x6   :  { %69 = vperm.xlu1 %319, %v59_v3  }
   0x7   :  { %41 = vperm.xlu0 %318, %v31_v4  }
   0x8   :  { %10 = vsyncpa [#allocation3], 0  ;;  %v61_v7 = vld [vmem:[%s471_s3 + $0x18] sm:$0xff]  ;;  %v60_v8 = vld [vmem:[%s471_s3 + $0x10] sm:$0xff]  ;;  %vm170_vm0 = vcmask 523264   ;;  %s353_s8 = smov [#allocation2]  }
   0x9   :  { %v103_v9 = vld [vmem:[%s472_s4 + $0x8] sm:$0xff]  ;;  %v102_v10 = vld [vmem:[%s472_s4] sm:$0xff]  ;;  %v105_v11 = vld [vmem:[%s472_s4 + $0x18] sm:$0xff]  ;;  %s261_s9 = sshll.u32 %s353_s8, 4  ;;  %s262_s9 = int_to_ptr.vmem [resolvable:$true] %s261_s9 }
   0xa   :  { %51 = vperm.xlu1 %319, %v33_v5   ;;  %v104_v12 = vld [vmem:[%s472_s4 + $0x10] sm:$0xff]  ;;  %v107_v13 = vld [vmem:[%s472_s4 + $0x28] sm:$0xff]  ;;  %v106_v14 = vld [vmem:[%s472_s4 + $0x20] sm:$0xff]  ;;  %p333_p1 = scmp.lt.s32.totalorder %s262_s9, %s262_s9 }
   0xb   :  { %46 = vperm.xlu0 %318, %v32_v6   ;;  %v109_v15 = vld [vmem:[%s472_s4 + $0x38] sm:$0xff]  ;;  %v108_v16 = vld [vmem:[%s472_s4 + $0x30] sm:$0xff]  ;;  %v322_v17 = vld [vmem:[%s469_s1] sm:$0xff]  }
   0xc   :  { %v323_v18 = vld [vmem:[%s469_s1 + $0x10] sm:$0xff]   ;;  %298 = vmatprep.mubr.msk.bf16.mxu0 %vm170_vm0, %v322_v17  ;;  %v22_v19 = vld [vmem:[%s468_s0] sm:$0xff]   ;;  %v25_v27 = vld [vmem:[%s468_s0 + $0x8] sm:$0xff]  }
   0xd   :  { %302 = vmatprep.mubr.msk.bf16.mxu1 %vm170_vm0, %v323_v18  ;;  %v26_v20 = vunpack.c.l.bf16 %v22_v19  ;;  %v27_v24 = vunpack.c.h.bf16 %v22_v19  ;;  %v29_v31 = vunpack.c.h.bf16 %v25_v27  ;;  %v28_v32 = vunpack.c.l.bf16 %v25_v27  ;;  %v324_v47 = vld [vmem:[%s469_s1 + $0x8] sm:$0xff]   ;;  %v325_v48 = vld [vmem:[%s469_s1 + $0x18] sm:$0xff]   ;;  %s328_s1 = scalar_lea.vmem %s262_s9, 1024 }
   0xe   :  { %79 = vperm.xlu1 %319, %v61_v7   ;;  %p329_p0 = scmp.ne.s32.totalorder %s262_s9, %s328_s1  ;;  %p334_p2 = scmp.lt.s32.totalorder %s328_s1, %s328_s1 }
   0xf   :  { %74 = vperm.xlu0 %318, %v60_v8  }
  0x10   :  { %p335_p3 = por %p334_p2, %p333_p1 }
  0x12   :  { %117 = vperm.xlu1 %319, %v103_v9   ;;  %p336_p4 = pnand %p335_p3, %p329_p0 }
  0x13   :  { %112 = vperm.xlu0 %318, %v102_v10  }
  0x16   :  { %127 = vperm.xlu1 %319, %v105_v11  }
  0x17   :  { %122 = vperm.xlu0 %318, %v104_v12  }
  0x1a   :  { %137 = vperm.xlu1 %319, %v107_v13  }
  0x1b   :  { %132 = vperm.xlu0 %318, %v106_v14  }
  0x1e   :  { %147 = vperm.xlu1 %319, %v109_v15  }
  0x1f   :  { %142 = vperm.xlu0 %318, %v108_v16  }
  0x81   :  { %v65_v21 = vpop.permute.xlu1 %64 }
  0x82   :  { %v37_v22 = vpop.permute.xlu0 %36 }
  0x83   :  { %v54_v23 = vmul.f32 %v37_v22, %v26_v20 }
  0x85   :  { %v70_v25 = vpop.permute.xlu1 %69  ;;  %v82_v28 = vadd.f32 %v65_v21, %v54_v23 }
  0x86   :  { %v42_v26 = vpop.permute.xlu0 %41 }
  0x87   :  { %v55_v29 = vmul.f32 %v42_v26, %v27_v24  ;;  %v86_v35 = vmax.f32 %v82_v28, 0.0 }
  0x89   :  { %v83_v30 = vadd.f32 %v70_v25, %v55_v29  ;;  %v52_v33 = vpop.permute.xlu1 %51 }
  0x8a   :  { %v47_v34 = vpop.permute.xlu0 %46  ;;  %v57_v38 = vmul.f32 %v52_v33, %v29_v31 }
  0x8b   :  { %v87_v36 = vmax.f32 %v83_v30, 0.0  ;;  %v56_v39 = vmul.f32 %v47_v34, %v28_v32 }
  0x8d   :  { %v90_v37 = vpack.c.bf16 %v87_v36, %v86_v35  ;;  %v80_v40 = vpop.permute.xlu1 %79 }
  0x8e   :  { %v75_v41 = vpop.permute.xlu0 %74  ;;  %v85_v42 = vadd.f32 %v80_v40, %v57_v38 }
  0x8f   :  { %v84_v43 = vadd.f32 %v75_v41, %v56_v39  ;;  %290 = vmatprep.subr.bf16.mxu0 %v90_v37  ;;  %306 = vmatprep.subr.bf16.mxu1 %v90_v37 }
  0x90   :  { %291 = vmatpush3.bf16.msra.mxu0 %v90_v37  ;;  %310 = vmatpush3.bf16.msra.mxu1 %v90_v37  ;;  %v89_v44 = vmax.f32 %v85_v42, 0.0 }
  0x91   :  { %v88_v45 = vmax.f32 %v84_v43, 0.0  ;;  %v118_v49 = vpop.permute.xlu1 %117 }
  0x92   :  { %v113_v50 = vpop.permute.xlu0 %112 }
  0x93   :  { %v91_v46 = vpack.c.bf16 %v89_v44, %v88_v45 }
  0x95   :  { %292 = vmatprep.subr.bf16.mxu0 %v91_v46  ;;  %307 = vmatprep.subr.bf16.mxu1 %v91_v46  ;;  %v128_v51 = vpop.permute.xlu1 %127 }
  0x96   :  { %293 = vmatpush3.bf16.msra.mxu0 %v91_v46  ;;  %311 = vmatpush3.bf16.msra.mxu1 %v91_v46  ;;  %v123_v52 = vpop.permute.xlu0 %122 }
  0x97   :  { %294 = vmatprep.subr.bf16.mxu0 %v22_v19  ;;  %308 = vmatprep.subr.bf16.mxu1 %v22_v19 }
  0x99   :  { %v138_v53 = vpop.permute.xlu1 %137 }
  0x9a   :  { %295 = vmatpush3.bf16.msra.mxu0 %v22_v19  ;;  %312 = vmatpush3.bf16.msra.mxu1 %v22_v19  ;;  %v133_v54 = vpop.permute.xlu0 %132 }
  0x9b   :  { %296 = vmatprep.subr.bf16.mxu0 %v25_v27  ;;  %309 = vmatprep.subr.bf16.mxu1 %v25_v27 }
  0x9d   :  { %v148_v55 = vpop.permute.xlu1 %147 }
  0x9e   :  { %297 = vmatpush3.bf16.msra.mxu0 %v25_v27  ;;  %313 = vmatpush3.bf16.msra.mxu1 %v25_v27  ;;  %v143_v56 = vpop.permute.xlu0 %142 }
  0xa1   :  { %299 = vmatmul.mubr.msk.bf16.vlgmr.msra.gmra.mrb[0].mxu0 %vm170_vm0, %v324_v47  ;;  %303 = vmatmul.mubr.msk.bf16.vlgmr.msra.gmra.mrb[0].mxu1 %vm170_vm0, %v325_v48 }
 0x174   :  { %v300_v57 = vpop.f32.mrb[0].mxu0  ;;  %v304_v58 = vpop.f32.mrb[0].mxu1 }
 0x175   :  { %v226_v59 = vadd.f32 %v300_v57, %v123_v52  ;;  %v242_v60 = vadd.f32 %v304_v58, %v143_v56  ;;  %v217_v61 = vpop.f32.mrb[1].mxu0  ;;  %v233_v62 = vpop.f32.mrb[1].mxu1 }
 0x176   :  { %v218_v63 = vadd.f32 %v217_v61, %v113_v50  ;;  %v234_v0 = vadd.f32 %v233_v62, %v133_v54  ;;  %v301_v1 = vpop.f32.mrb[2].mxu0  ;;  %v305_v2 = vpop.f32.mrb[2].mxu1 }
 0x177   :  { %250 = vst [vmem:[#allocation2 + $0x10] sm:$0xff] %v226_v59  ;;  %254 = vst [vmem:[#allocation2 + $0x30] sm:$0xff] %v242_v60  ;;  %v229_v3 = vadd.f32 %v301_v1, %v128_v51  ;;  %v245_v4 = vadd.f32 %v305_v2, %v148_v55  ;;  %v220_v5 = vpop.f32.mrb[3].mxu0  ;;  %v236_v6 = vpop.f32.mrb[3].mxu1 }
 0x178   :  { %248 = vst [vmem:[#allocation2] sm:$0xff] %v218_v63  ;;  %252 = vst [vmem:[#allocation2 + $0x20] sm:$0xff] %v234_v0  ;;  %v221_v7 = vadd.f32 %v220_v5, %v118_v49  ;;  %v237_v8 = vadd.f32 %v236_v6, %v138_v53 }
 0x179   :  { %251 = vst [vmem:[#allocation2 + $0x18] sm:$0xff] %v229_v3  ;;  %255 = vst [vmem:[#allocation2 + $0x38] sm:$0xff] %v245_v4 }
 0x17a   :  { %249 = vst [vmem:[#allocation2 + $0x8] sm:$0xff] %v221_v7  ;;  %253 = vst [vmem:[#allocation2 + $0x28] sm:$0xff] %v237_v8 }
 0x17b   :  { %339 = shalt.err (!%p336_p4)
}
 0x17c   :  { %s340_s12 = scalar_lea.hbm %s473_s5, 1024 }
 0x17d   :  { %p341_p5 = scmp.ne.s32.totalorder %s473_s5, %s340_s12  ;;  %p344_p6 = scmp.lt.u32.totalorder %s340_s12, %s473_s5 }
 0x17f   :  { %p346_p7 = pnand %p344_p6, %p341_p5 }
 0x181   :  { %349 = shalt.err (!%p346_p7)
}
 0x182   :  { %s354_s3 = smov 128   ;;  %s355_s16 = smov 8  }
 0x183   :  { %267 = dma.vmem_to_hbm [thread:$0]  %s262_s9, 1024, %s473_s5, [#allocation3], %s354_s3, %s354_s3, %s355_s16  }
 0x184   :  { %350 = dma.done.wait [#allocation3], 1024  }
 0x185   :  { %351 = vsyncadd [#allocation3], 4294966272 }
 0x186   :  { %271 = vsyncpa [#allocation3], 1 }

</bundles_post_ra>
